<compile_context>
chip_gen: v7x
topology: tpu7x:2x2x1
jax: 0.10.0
libtpu: 0.0.40
codegen_flags: <defaults>
</compile_context>

<pallas_src>
import numpy as np
import jax
import jax.numpy as jnp
from jax import lax
from jax.experimental import pallas as pl
from jax.experimental.pallas import tpu as pltpu

# ----------------------------- config (small synthetic shapes) ------------------------
HIDDEN = 32
NUM_HEADS = 4
NUM_KV_HEADS = 2
HEAD_DIM = 16
SEQ = 8
ROPE_THETA = 10000.0
LOGIT_CAP = 30.0                      # attn_logit_softcapping default in Grok1Attention
SCALING = HEAD_DIM ** -0.5

Q_SIZE = NUM_HEADS * HEAD_DIM         # 64
KV_SIZE = NUM_KV_HEADS * HEAD_DIM     # 32
QKV_OUT = Q_SIZE + 2 * KV_SIZE        # 128
GROUP = NUM_HEADS // NUM_KV_HEADS     # GQA group size


# --------------------------------- fused Pallas kernel --------------------------------
def _grok1_attn_kernel(x_ref, wqkv_ref, wo_ref, cos_ref, sin_ref, rot_ref, o_ref):
    t = x_ref.shape[0]

    # ---- qkv projection: bf16 MXU operands, f32 accumulation ------------------------
    x_bf = x_ref[...].astype(jnp.bfloat16)
    qkv = jnp.dot(x_bf, wqkv_ref[...], preferred_element_type=jnp.float32)  # (T,QKV) f32
    q = qkv[:, :Q_SIZE]                                   # (T, NH*D)
    k = qkv[:, Q_SIZE:Q_SIZE + KV_SIZE]                   # (T, NKV*D)
    v = qkv[:, Q_SIZE + KV_SIZE:]                         # (T, NKV*D)

    cos = cos_ref[...]                                    # (T, D) f32, shared by heads
    sin = sin_ref[...]
    rot = rot_ref[...]                                    # (D, D) bf16, exact +-1 / 0

    # ---- neox RoPE on row-stacked heads:  x*cos + (x @ R)*sin  (R is per-head DxD) ---
    # Row-stack heads once -> ONE RoPE matmul for all q heads and one for all k heads.
    q_stack = jnp.concatenate(
        [q[:, h * HEAD_DIM:(h + 1) * HEAD_DIM] for h in range(NUM_HEADS)], axis=0)
    k_stack = jnp.concatenate(
        [k[:, h * HEAD_DIM:(h + 1) * HEAD_DIM] for h in range(NUM_KV_HEADS)], axis=0)
    cos_q = jnp.concatenate([cos] * NUM_HEADS, axis=0)    # (NH*T, D)
    sin_q = jnp.concatenate([sin] * NUM_HEADS, axis=0)
    cos_k = jnp.concatenate([cos] * NUM_KV_HEADS, axis=0)
    sin_k = jnp.concatenate([sin] * NUM_KV_HEADS, axis=0)

    q_rot = jnp.dot(q_stack.astype(jnp.bfloat16), rot, preferred_element_type=jnp.float32)
    k_rot = jnp.dot(k_stack.astype(jnp.bfloat16), rot, preferred_element_type=jnp.float32)
    q_stack = q_stack * cos_q + q_rot * sin_q             # f32 VPU math
    k_stack = k_stack * cos_k + k_rot * sin_k
    q_bf = q_stack.astype(jnp.bfloat16)                   # (NH*T, D)
    k_bf = k_stack.astype(jnp.bfloat16)                   # (NKV*T, D)

    # ---- causal mask for a (GROUP*T, T) score block (heads stacked along rows) ------
    row = lax.broadcasted_iota(jnp.int32, (t, t), 0)
    rows = jnp.concatenate([row] * GROUP, axis=0)                       # (GROUP*T, T)
    cols = lax.broadcasted_iota(jnp.int32, (GROUP * t, t), 1)
    causal = cols <= rows

    # ---- causal GQA attention with logit soft-capping; outputs stay in registers ----
    head_outs = [None] * NUM_HEADS
    # TODO(synk): at production head counts move this loop to a 'parallel' grid axis
    #             (or lax.fori_loop) instead of a fully-unrolled Python for.
    for kvh in range(NUM_KV_HEADS):
        kh_bf = k_bf[kvh * t:(kvh + 1) * t, :]                          # (T, D)
        vh_bf = v[:, kvh * HEAD_DIM:(kvh + 1) * HEAD_DIM].astype(jnp.bfloat16)
        # all GROUP query heads of this KV head in ONE MXU call
        qg_bf = q_bf[kvh * GROUP * t:(kvh + 1) * GROUP * t, :]          # (GROUP*T, D)

        # contract last dims directly -> no materialized transpose of K
        s = lax.dot_general(qg_bf, kh_bf, (((1,), (1,)), ((), ())),
                            preferred_element_type=jnp.float32)         # (GROUP*T, T)
        # fold scale and soft-cap divide into a single multiply
        s = s * (SCALING / LOGIT_CAP)
        s = LOGIT_CAP * jnp.tanh(s)                                     # EUP
        # mask AFTER soft-cap (matches reference); every causal row has its diagonal,
        # so the row max stays finite and exp never sees NaN.
        s = jnp.where(causal, s, -jnp.inf)
        m = jnp.max(s, axis=-1, keepdims=True)
        p = jnp.exp(s - m)                                              # EUP
        denom = jnp.sum(p, axis=-1, keepdims=True)
        r = pl.reciprocal(denom, approx=True)                           # EUP slot
        r = r * (2.0 - denom * r)                                       # Newton refine
        p = p * r

        pv = jnp.dot(p.astype(jnp.bfloat16), vh_bf,
                     preferred_element_type=jnp.float32)                # (GROUP*T, D)
        for g in range(GROUP):
            head_outs[kvh * GROUP + g] = pv[g * t:(g + 1) * t, :]       # (T, D) in regs

    # ---- one lane-dense slab -> o_proj -> single full-width store --------------------
    attn = jnp.concatenate(head_outs, axis=-1).astype(jnp.bfloat16)     # (T, NH*D)
    o_ref[...] = jnp.dot(attn, wo_ref[...], preferred_element_type=jnp.float32)


# --------------------------------- host-side helpers ----------------------------------
def _rotate_half_matrix():
    """Per-head (D, D) matrix R such that x @ R == rotate_half(x) (neox style)."""
    half = HEAD_DIM // 2
    m = np.zeros((HEAD_DIM, HEAD_DIM), dtype=np.float32)
    for j in range(half):
        m[j + half, j] = -1.0          # out[:half]  = -x[half:]
        m[j, j + half] = 1.0           # out[half:]  =  x[:half]
    return jnp.asarray(m, dtype=jnp.bfloat16)   # exact in bf16


def _rope_tables(positions):
    """(T, HEAD_DIM) cos/sin tables, neox layout, shared by all heads."""
    inv_freq = 1.0 / (ROPE_THETA ** (jnp.arange(0, HEAD_DIM, 2, dtype=jnp.float32)
                                     / HEAD_DIM))
    freqs = positions.astype(jnp.float32)[:, None] * inv_freq[None, :]   # (T, D/2)
    cos = jnp.concatenate([jnp.cos(freqs), jnp.cos(freqs)], axis=-1)     # (T, D)
    sin = jnp.concatenate([jnp.sin(freqs), jnp.sin(freqs)], axis=-1)     # (T, D)
    return cos, sin


def _cost_estimate(T):
    proj = 2 * T * HIDDEN * QKV_OUT + 2 * T * Q_SIZE * HIDDEN
    rope = 2 * (NUM_HEADS + NUM_KV_HEADS) * T * HEAD_DIM * HEAD_DIM
    attn = 2 * NUM_HEADS * T * T * HEAD_DIM * 2
    transcendentals = 2 * NUM_HEADS * T * T              # tanh + exp
    bytes_accessed = (4 * T * HIDDEN * 2                 # x in + out (f32)
                      + 2 * (HIDDEN * QKV_OUT + Q_SIZE * HIDDEN)   # bf16 weights
                      + 4 * 2 * T * HEAD_DIM             # cos/sin (f32)
                      + 2 * HEAD_DIM * HEAD_DIM)         # rot (bf16)
    return pl.CostEstimate(flops=proj + rope + attn,
                           transcendentals=transcendentals,
                           bytes_accessed=bytes_accessed)


def grok1_attention_forward(positions, hidden_states, w_qkv, w_o):
    """Fused Grok1Attention forward.  hidden_states: (T, HIDDEN) -> (T, HIDDEN)."""
    T = hidden_states.shape[0]
    cos, sin = _rope_tables(positions)              # (T, D) each, f32
    rot = _rotate_half_matrix()                     # (D, D) bf16
    w_qkv_bf = w_qkv.astype(jnp.bfloat16)           # weights stored bf16 for the MXU
    w_o_bf = w_o.astype(jnp.bfloat16)

    return pl.pallas_call(
        _grok1_attn_kernel,
        out_shape=jax.ShapeDtypeStruct((T, HIDDEN), jnp.float32),
        grid=(1,),
        in_specs=[
            pl.BlockSpec((T, HIDDEN), lambda i: (0, 0)),           # hidden_states
            pl.BlockSpec((HIDDEN, QKV_OUT), lambda i: (0, 0)),     # w_qkv (bf16)
            pl.BlockSpec((Q_SIZE, HIDDEN), lambda i: (0, 0)),      # w_o   (bf16)
            pl.BlockSpec((T, HEAD_DIM), lambda i: (0, 0)),         # cos (per-head width)
            pl.BlockSpec((T, HEAD_DIM), lambda i: (0, 0)),         # sin (per-head width)
            pl.BlockSpec((HEAD_DIM, HEAD_DIM), lambda i: (0, 0)),  # rotate-half matrix
        ],
        out_specs=pl.BlockSpec((T, HIDDEN), lambda i: (0, 0)),
        compiler_params=pltpu.CompilerParams(
            dimension_semantics=("arbitrary",),
            vmem_limit_bytes=32 * 1024 * 1024),
        cost_estimate=_cost_estimate(T),
    )(hidden_states, w_qkv_bf, w_o_bf, cos, sin, rot)


# --------------------------------- pure-JAX reference ---------------------------------
def reference_forward(positions, hidden_states, w_qkv, w_o):
    T = hidden_states.shape[0]
    qkv = hidden_states @ w_qkv
    q = qkv[:, :Q_SIZE].reshape(T, NUM_HEADS, HEAD_DIM)
    k = qkv[:, Q_SIZE:Q_SIZE + KV_SIZE].reshape(T, NUM_KV_HEADS, HEAD_DIM)
    v = qkv[:, Q_SIZE + KV_SIZE:].reshape(T, NUM_KV_HEADS, HEAD_DIM)
    half = HEAD_DIM // 2
    inv_freq = 1.0 / (ROPE_THETA ** (jnp.arange(0, HEAD_DIM, 2, dtype=jnp.float32)
                                     / HEAD_DIM))
    freqs = positions.astype(jnp.float32)[:, None] * inv_freq[None, :]
    cos_b, sin_b = jnp.cos(freqs)[:, None, :], jnp.sin(freqs)[:, None, :]

    def rot(x):
        x1, x2 = x[..., :half], x[..., half:]
        return jnp.concatenate([x1 * cos_b - x2 * sin_b,
                                x2 * cos_b + x1 * sin_b], axis=-1)

    q, k = rot(q), rot(k)
    k_rep = jnp.repeat(k, GROUP, axis=1)
    v_rep = jnp.repeat(v, GROUP, axis=1)
    s = jnp.einsum("tnd,snd->nts", q, k_rep) * SCALING
    s = LOGIT_CAP * jnp.tanh(s / LOGIT_CAP)
    mask = jnp.tril(jnp.ones((T, T), dtype=bool))
    s = jnp.where(mask[None], s, -jnp.inf)
    p = jax.nn.softmax(s, axis=-1)
    o = jnp.einsum("nts,snd->tnd", p, v_rep).reshape(T, Q_SIZE)
    return o @ w_o


# ----------------------------------- main ----------------------------------------------
if __name__ == "__main__":
    key = jax.random.PRNGKey(0)
    k1, k2, k3 = jax.random.split(key, 3)

    hidden_states = jax.random.normal(k1, (SEQ, HIDDEN), dtype=jnp.float32)
    positions = jnp.arange(SEQ, dtype=jnp.int32)
    # deterministic synthetic weights (stored [in, out] so y = x @ W)
    w_qkv = jax.random.normal(k2, (HIDDEN, QKV_OUT), dtype=jnp.float32) * 0.05
    w_o = jax.random.normal(k3, (Q_SIZE, HIDDEN), dtype=jnp.float32) * 0.05

    fwd = jax.jit(grok1_attention_forward)
    out = fwd(positions, hidden_states, w_qkv, w_o)
    out = jax.block_until_ready(out)

    ref = reference_forward(positions, hidden_states, w_qkv, w_o)
    assert out.shape == (SEQ, HIDDEN)
    # tolerance accounts for bf16 MXU operands (f32 accumulation) vs the f32 reference
    assert jnp.allclose(out, ref, atol=2e-2, rtol=2e-2), "mismatch vs reference"

    print("KERNEL_OK")
</pallas_src>

<mosaic_0001>
module attributes {stable_mosaic.version = 11 : i64} {
  func.func @_grok1_attn_kernel(%arg0: i32, %arg1: memref<8x32xf32, #tpu.memory_space<vmem>>, %arg2: memref<32x128xbf16, #tpu.memory_space<vmem>>, %arg3: memref<64x32xbf16, #tpu.memory_space<vmem>>, %arg4: memref<8x16xf32, #tpu.memory_space<vmem>>, %arg5: memref<8x16xf32, #tpu.memory_space<vmem>>, %arg6: memref<16x16xbf16, #tpu.memory_space<vmem>>, %arg7: memref<8x32xf32, #tpu.memory_space<vmem>>) attributes {dimension_semantics = [#tpu.dimension_semantics<arbitrary>], iteration_bounds = array<i64: 1>, scalar_prefetch = 0 : i64, scratch_operands = 0 : i64, tpu.core_type = #tpu.core_type<tc>, window_params = [{pipeline_mode = #tpu.pipeline_mode<synchronous>, transform_indices = @transform_0, window_bounds = array<i64: 8, 32>}, {pipeline_mode = #tpu.pipeline_mode<synchronous>, transform_indices = @transform_1, window_bounds = array<i64: 32, 128>}, {pipeline_mode = #tpu.pipeline_mode<synchronous>, transform_indices = @transform_2, window_bounds = array<i64: 64, 32>}, {pipeline_mode = #tpu.pipeline_mode<synchronous>, transform_indices = @transform_3, window_bounds = array<i64: 8, 16>}, {pipeline_mode = #tpu.pipeline_mode<synchronous>, transform_indices = @transform_4, window_bounds = array<i64: 8, 16>}, {pipeline_mode = #tpu.pipeline_mode<synchronous>, transform_indices = @transform_5, window_bounds = array<i64: 16, 16>}, {pipeline_mode = #tpu.pipeline_mode<synchronous>, transform_indices = @transform_6, window_bounds = array<i64: 8, 32>}]} {
    %c0 = arith.constant 0 : index
    %c0_0 = arith.constant 0 : index
    %0 = vector.load %arg1[%c0, %c0_0] : memref<8x32xf32, #tpu.memory_space<vmem>>, vector<8x32xf32>
    %1 = arith.truncf %0 : vector<8x32xf32> to vector<8x32xbf16>
    %c0_1 = arith.constant 0 : index
    %c0_2 = arith.constant 0 : index
    %2 = vector.load %arg2[%c0_1, %c0_2] : memref<32x128xbf16, #tpu.memory_space<vmem>>, vector<32x128xbf16>
    %cst = arith.constant dense<0.000000e+00> : vector<8x128xf32>
    %3 = tpu.matmul %1, %2, %cst {dimension_numbers = #tpu.dot_dimension_numbers<[1], [0], [0], [1], [0, 0, 1, 1], [], []>} : vector<8x32xbf16>, vector<32x128xbf16>, vector<8x128xf32> -> vector<8x128xf32>
    %4 = vector.extract_strided_slice %3 {offsets = [0, 0], sizes = [8, 64], strides = [1, 1]} : vector<8x128xf32> to vector<8x64xf32>
    %5 = vector.extract_strided_slice %3 {offsets = [0, 64], sizes = [8, 32], strides = [1, 1]} : vector<8x128xf32> to vector<8x32xf32>
    %6 = vector.extract_strided_slice %3 {offsets = [0, 96], sizes = [8, 32], strides = [1, 1]} : vector<8x128xf32> to vector<8x32xf32>
    %c0_3 = arith.constant 0 : index
    %c0_4 = arith.constant 0 : index
    %7 = vector.load %arg4[%c0_3, %c0_4] : memref<8x16xf32, #tpu.memory_space<vmem>>, vector<8x16xf32>
    %c0_5 = arith.constant 0 : index
    %c0_6 = arith.constant 0 : index
    %8 = vector.load %arg5[%c0_5, %c0_6] : memref<8x16xf32, #tpu.memory_space<vmem>>, vector<8x16xf32>
    %c0_7 = arith.constant 0 : index
    %c0_8 = arith.constant 0 : index
    %9 = vector.load %arg6[%c0_7, %c0_8] : memref<16x16xbf16, #tpu.memory_space<vmem>>, vector<16x16xbf16>
    %10 = vector.extract_strided_slice %4 {offsets = [0, 0], sizes = [8, 16], strides = [1, 1]} : vector<8x64xf32> to vector<8x16xf32>
    %11 = vector.extract_strided_slice %4 {offsets = [0, 16], sizes = [8, 16], strides = [1, 1]} : vector<8x64xf32> to vector<8x16xf32>
    %12 = vector.extract_strided_slice %4 {offsets = [0, 32], sizes = [8, 16], strides = [1, 1]} : vector<8x64xf32> to vector<8x16xf32>
    %13 = vector.extract_strided_slice %4 {offsets = [0, 48], sizes = [8, 16], strides = [1, 1]} : vector<8x64xf32> to vector<8x16xf32>
    %14 = tpu.concatenate %10, %11, %12, %13 in 0 : vector<8x16xf32>, vector<8x16xf32>, vector<8x16xf32>, vector<8x16xf32> -> vector<32x16xf32>
    %15 = vector.extract_strided_slice %5 {offsets = [0, 0], sizes = [8, 16], strides = [1, 1]} : vector<8x32xf32> to vector<8x16xf32>
    %16 = vector.extract_strided_slice %5 {offsets = [0, 16], sizes = [8, 16], strides = [1, 1]} : vector<8x32xf32> to vector<8x16xf32>
    %17 = tpu.concatenate %15, %16 in 0 : vector<8x16xf32>, vector<8x16xf32> -> vector<16x16xf32>
    %18 = tpu.concatenate %7, %7, %7, %7 in 0 : vector<8x16xf32>, vector<8x16xf32>, vector<8x16xf32>, vector<8x16xf32> -> vector<32x16xf32>
    %19 = tpu.concatenate %8, %8, %8, %8 in 0 : vector<8x16xf32>, vector<8x16xf32>, vector<8x16xf32>, vector<8x16xf32> -> vector<32x16xf32>
    %20 = tpu.concatenate %7, %7 in 0 : vector<8x16xf32>, vector<8x16xf32> -> vector<16x16xf32>
    %21 = tpu.concatenate %8, %8 in 0 : vector<8x16xf32>, vector<8x16xf32> -> vector<16x16xf32>
    %22 = arith.truncf %14 : vector<32x16xf32> to vector<32x16xbf16>
    %cst_9 = arith.constant dense<0.000000e+00> : vector<32x16xf32>
    %23 = tpu.matmul %22, %9, %cst_9 {dimension_numbers = #tpu.dot_dimension_numbers<[1], [0], [0], [1], [0, 0, 1, 1], [], []>} : vector<32x16xbf16>, vector<16x16xbf16>, vector<32x16xf32> -> vector<32x16xf32>
    %24 = arith.truncf %17 : vector<16x16xf32> to vector<16x16xbf16>
    %cst_10 = arith.constant dense<0.000000e+00> : vector<16x16xf32>
    %25 = tpu.matmul %24, %9, %cst_10 {dimension_numbers = #tpu.dot_dimension_numbers<[1], [0], [0], [1], [0, 0, 1, 1], [], []>} : vector<16x16xbf16>, vector<16x16xbf16>, vector<16x16xf32> -> vector<16x16xf32>
    %26 = arith.mulf %14, %18 : vector<32x16xf32>
    %27 = arith.mulf %23, %19 : vector<32x16xf32>
    %28 = arith.addf %26, %27 : vector<32x16xf32>
    %29 = arith.mulf %17, %20 : vector<16x16xf32>
    %30 = arith.mulf %25, %21 : vector<16x16xf32>
    %31 = arith.addf %29, %30 : vector<16x16xf32>
    %32 = arith.truncf %28 : vector<32x16xf32> to vector<32x16xbf16>
    %33 = arith.truncf %31 : vector<16x16xf32> to vector<16x16xbf16>
    %34 = tpu.iota {dimensions = array<i32: 0>} : vector<8x8xi32>
    %35 = tpu.concatenate %34, %34 in 0 : vector<8x8xi32>, vector<8x8xi32> -> vector<16x8xi32>
    %36 = tpu.iota {dimensions = array<i32: 1>} : vector<16x8xi32>
    %37 = arith.cmpi sle, %36, %35 : vector<16x8xi32>
    %38 = vector.extract_strided_slice %33 {offsets = [0, 0], sizes = [8, 16], strides = [1, 1]} : vector<16x16xbf16> to vector<8x16xbf16>
    %39 = vector.extract_strided_slice %6 {offsets = [0, 0], sizes = [8, 16], strides = [1, 1]} : vector<8x32xf32> to vector<8x16xf32>
    %40 = arith.truncf %39 : vector<8x16xf32> to vector<8x16xbf16>
    %41 = vector.extract_strided_slice %32 {offsets = [0, 0], sizes = [16, 16], strides = [1, 1]} : vector<32x16xbf16> to vector<16x16xbf16>
    %cst_11 = arith.constant dense<0.000000e+00> : vector<16x8xf32>
    %42 = tpu.matmul %41, %38, %cst_11 {dimension_numbers = #tpu.dot_dimension_numbers<[1], [1], [0], [0], [0, 0, 1, 0], [], []>} : vector<16x16xbf16>, vector<8x16xbf16>, vector<16x8xf32> -> vector<16x8xf32>
    %cst_12 = arith.constant 0.00833333377 : f32
    %43 = vector.broadcast %cst_12 : f32 to vector<16x8xf32>
    %44 = arith.mulf %42, %43 : vector<16x8xf32>
    %45 = math.tanh %44 : vector<16x8xf32>
    %cst_13 = arith.constant 3.000000e+01 : f32
    %46 = vector.broadcast %cst_13 : f32 to vector<16x8xf32>
    %47 = arith.mulf %46, %45 : vector<16x8xf32>
    %cst_14 = arith.constant 0xFF800000 : f32
    %48 = vector.broadcast %cst_14 : f32 to vector<16x8xf32>
    %49 = arith.select %37, %47, %48 : vector<16x8xi1>, vector<16x8xf32>
    %cst_15 = arith.constant dense<0xFF800000> : vector<16xf32>
    %50 = vector.multi_reduction <maximumf>, %49, %cst_15 [1] : vector<16x8xf32> to vector<16xf32>
    %51 = vector.shape_cast %50 : vector<16xf32> to vector<16x1xf32>
    %52 = vector.broadcast %51 : vector<16x1xf32> to vector<16x8xf32>
    %53 = arith.subf %49, %52 : vector<16x8xf32>
    %54 = math.exp %53 : vector<16x8xf32>
    %cst_16 = arith.constant dense<0.000000e+00> : vector<16xf32>
    %55 = vector.multi_reduction <add>, %54, %cst_16 [1] : vector<16x8xf32> to vector<16xf32>
    %56 = vector.shape_cast %55 : vector<16xf32> to vector<16x1xf32>
    %57 = tpu.reciprocal %56 {approx = true} : vector<16x1xf32> -> vector<16x1xf32>
    %58 = arith.mulf %56, %57 : vector<16x1xf32>
    %cst_17 = arith.constant 2.000000e+00 : f32
    %59 = vector.broadcast %cst_17 : f32 to vector<16x1xf32>
    %60 = arith.subf %59, %58 : vector<16x1xf32>
    %61 = arith.mulf %57, %60 : vector<16x1xf32>
    %62 = vector.broadcast %61 : vector<16x1xf32> to vector<16x8xf32>
    %63 = arith.mulf %54, %62 : vector<16x8xf32>
    %64 = arith.truncf %63 : vector<16x8xf32> to vector<16x8xbf16>
    %cst_18 = arith.constant dense<0.000000e+00> : vector<16x16xf32>
    %65 = tpu.matmul %64, %40, %cst_18 {dimension_numbers = #tpu.dot_dimension_numbers<[1], [0], [0], [1], [0, 0, 1, 1], [], []>} : vector<16x8xbf16>, vector<8x16xbf16>, vector<16x16xf32> -> vector<16x16xf32>
    %66 = vector.extract_strided_slice %65 {offsets = [0, 0], sizes = [8, 16], strides = [1, 1]} : vector<16x16xf32> to vector<8x16xf32>
    %67 = vector.extract_strided_slice %65 {offsets = [8, 0], sizes = [8, 16], strides = [1, 1]} : vector<16x16xf32> to vector<8x16xf32>
    %68 = vector.extract_strided_slice %33 {offsets = [8, 0], sizes = [8, 16], strides = [1, 1]} : vector<16x16xbf16> to vector<8x16xbf16>
    %69 = vector.extract_strided_slice %6 {offsets = [0, 16], sizes = [8, 16], strides = [1, 1]} : vector<8x32xf32> to vector<8x16xf32>
    %70 = arith.truncf %69 : vector<8x16xf32> to vector<8x16xbf16>
    %71 = vector.extract_strided_slice %32 {offsets = [16, 0], sizes = [16, 16], strides = [1, 1]} : vector<32x16xbf16> to vector<16x16xbf16>
    %cst_19 = arith.constant dense<0.000000e+00> : vector<16x8xf32>
    %72 = tpu.matmul %71, %68, %cst_19 {dimension_numbers = #tpu.dot_dimension_numbers<[1], [1], [0], [0], [0, 0, 1, 0], [], []>} : vector<16x16xbf16>, vector<8x16xbf16>, vector<16x8xf32> -> vector<16x8xf32>
    %cst_20 = arith.constant 0.00833333377 : f32
    %73 = vector.broadcast %cst_20 : f32 to vector<16x8xf32>
    %74 = arith.mulf %72, %73 : vector<16x8xf32>
    %75 = math.tanh %74 : vector<16x8xf32>
    %cst_21 = arith.constant 3.000000e+01 : f32
    %76 = vector.broadcast %cst_21 : f32 to vector<16x8xf32>
    %77 = arith.mulf %76, %75 : vector<16x8xf32>
    %cst_22 = arith.constant 0xFF800000 : f32
    %78 = vector.broadcast %cst_22 : f32 to vector<16x8xf32>
    %79 = arith.select %37, %77, %78 : vector<16x8xi1>, vector<16x8xf32>
    %cst_23 = arith.constant dense<0xFF800000> : vector<16xf32>
    %80 = vector.multi_reduction <maximumf>, %79, %cst_23 [1] : vector<16x8xf32> to vector<16xf32>
    %81 = vector.shape_cast %80 : vector<16xf32> to vector<16x1xf32>
    %82 = vector.broadcast %81 : vector<16x1xf32> to vector<16x8xf32>
    %83 = arith.subf %79, %82 : vector<16x8xf32>
    %84 = math.exp %83 : vector<16x8xf32>
    %cst_24 = arith.constant dense<0.000000e+00> : vector<16xf32>
    %85 = vector.multi_reduction <add>, %84, %cst_24 [1] : vector<16x8xf32> to vector<16xf32>
    %86 = vector.shape_cast %85 : vector<16xf32> to vector<16x1xf32>
    %87 = tpu.reciprocal %86 {approx = true} : vector<16x1xf32> -> vector<16x1xf32>
    %88 = arith.mulf %86, %87 : vector<16x1xf32>
    %cst_25 = arith.constant 2.000000e+00 : f32
    %89 = vector.broadcast %cst_25 : f32 to vector<16x1xf32>
    %90 = arith.subf %89, %88 : vector<16x1xf32>
    %91 = arith.mulf %87, %90 : vector<16x1xf32>
    %92 = vector.broadcast %91 : vector<16x1xf32> to vector<16x8xf32>
    %93 = arith.mulf %84, %92 : vector<16x8xf32>
    %94 = arith.truncf %93 : vector<16x8xf32> to vector<16x8xbf16>
    %cst_26 = arith.constant dense<0.000000e+00> : vector<16x16xf32>
    %95 = tpu.matmul %94, %70, %cst_26 {dimension_numbers = #tpu.dot_dimension_numbers<[1], [0], [0], [1], [0, 0, 1, 1], [], []>} : vector<16x8xbf16>, vector<8x16xbf16>, vector<16x16xf32> -> vector<16x16xf32>
    %96 = vector.extract_strided_slice %95 {offsets = [0, 0], sizes = [8, 16], strides = [1, 1]} : vector<16x16xf32> to vector<8x16xf32>
    %97 = vector.extract_strided_slice %95 {offsets = [8, 0], sizes = [8, 16], strides = [1, 1]} : vector<16x16xf32> to vector<8x16xf32>
    %98 = tpu.concatenate %66, %67, %96, %97 in 1 : vector<8x16xf32>, vector<8x16xf32>, vector<8x16xf32>, vector<8x16xf32> -> vector<8x64xf32>
    %99 = arith.truncf %98 : vector<8x64xf32> to vector<8x64xbf16>
    %c0_27 = arith.constant 0 : index
    %c0_28 = arith.constant 0 : index
    %100 = vector.load %arg3[%c0_27, %c0_28] : memref<64x32xbf16, #tpu.memory_space<vmem>>, vector<64x32xbf16>
    %cst_29 = arith.constant dense<0.000000e+00> : vector<8x32xf32>
    %101 = tpu.matmul %99, %100, %cst_29 {dimension_numbers = #tpu.dot_dimension_numbers<[1], [0], [0], [1], [0, 0, 1, 1], [], []>} : vector<8x64xbf16>, vector<64x32xbf16>, vector<8x32xf32> -> vector<8x32xf32>
    %c0_30 = arith.constant 0 : index
    %c0_31 = arith.constant 0 : index
    %102 = vector.load %arg7[%c0_30, %c0_31] : memref<8x32xf32, #tpu.memory_space<vmem>>, vector<8x32xf32>
    tpu.vector_store %arg7[%c0_30, %c0_31], %101 {strides = array<i32>} : memref<8x32xf32, #tpu.memory_space<vmem>>, vector<8x32xf32>,
    return
  }
  func.func @transform_0(%arg0: i32) -> (i32, i32) {
    %c0_i32 = arith.constant 0 : i32
    %c0_i32_0 = arith.constant 0 : i32
    %c0_i32_1 = arith.constant 0 : i32
    return %c0_i32, %c0_i32_0 : i32, i32
  }
  func.func @transform_1(%arg0: i32) -> (i32, i32) {
    %c0_i32 = arith.constant 0 : i32
    %c0_i32_0 = arith.constant 0 : i32
    %c0_i32_1 = arith.constant 0 : i32
    return %c0_i32, %c0_i32_0 : i32, i32
  }
  func.func @transform_2(%arg0: i32) -> (i32, i32) {
    %c0_i32 = arith.constant 0 : i32
    %c0_i32_0 = arith.constant 0 : i32
    %c0_i32_1 = arith.constant 0 : i32
    return %c0_i32, %c0_i32_0 : i32, i32
  }
  func.func @transform_3(%arg0: i32) -> (i32, i32) {
    %c0_i32 = arith.constant 0 : i32
    %c0_i32_0 = arith.constant 0 : i32
    %c0_i32_1 = arith.constant 0 : i32
    return %c0_i32, %c0_i32_0 : i32, i32
  }
  func.func @transform_4(%arg0: i32) -> (i32, i32) {
    %c0_i32 = arith.constant 0 : i32
    %c0_i32_0 = arith.constant 0 : i32
    %c0_i32_1 = arith.constant 0 : i32
    return %c0_i32, %c0_i32_0 : i32, i32
  }
  func.func @transform_5(%arg0: i32) -> (i32, i32) {
    %c0_i32 = arith.constant 0 : i32
    %c0_i32_0 = arith.constant 0 : i32
    %c0_i32_1 = arith.constant 0 : i32
    return %c0_i32, %c0_i32_0 : i32, i32
  }
  func.func @transform_6(%arg0: i32) -> (i32, i32) {
    %c0_i32 = arith.constant 0 : i32
    %c0_i32_0 = arith.constant 0 : i32
    %c0_i32_1 = arith.constant 0 : i32
    return %c0_i32, %c0_i32_0 : i32, i32
  }
}

</mosaic_0001>

<bundles_post_ra>
// kernel: grok1_attention_forward.1
= control target key start
LH: loop header
LB: loop body
LE: loop exit
PB: predicated region body
PF: predicated region fallthrough
CT: control target
= control target key end

     0   :  { %v792_v1 = vmov 0.0   ;;  %vm793_vm0 = vmmov 0   ;;  %s951_s0 = inlined_call_operand.vmem [shape: f32[8,32], index: 0, kind: input, shape index: {}]   ;;  %s952_s1 = inlined_call_operand.vmem [shape: bf16[32,128], index: 1, kind: input, shape index: {}]   ;;  %s953_s2 = inlined_call_operand.vmem [shape: bf16[64,32], index: 2, kind: input, shape index: {}]   ;;  %s954_s3 = inlined_call_operand.vmem [shape: f32[8,16], index: 3, kind: input, shape index: {}]   ;;  %s955_s4 = inlined_call_operand.vmem [shape: f32[8,16], index: 4, kind: input, shape index: {}]   ;;  %s956_s5 = inlined_call_operand.vmem [shape: bf16[16,16], index: 5, kind: input, shape index: {}]   ;;  %s957_s6 = inlined_call_operand.hbm [shape: f32[8,32], index: 6, kind: output, shape index: {}]  }
   0x1   :  { %v737_v0 = vld [vmem:[%s952_s1] sm:$0xff]   ;;  %671 = vmatprep.subr.bf16.mxu0 %v792_v1  ;;  %v738_v2 = vld [vmem:[%s952_s1 + $0x8] sm:$0xff]   ;;  %675 = vmatprep.mubr.msk.bf16.mxu0 %vm793_vm0, %v792_v1 }
   0x2   :  { %672 = vmatpush3.bf16.msra.mxu0 %v737_v0  ;;  %v25_v3 = vld [vmem:[%s951_s0] sm:$0xff] }
   0x3   :  { %673 = vmatprep.subr.bf16.mxu0 %v792_v1  ;;  %v26_v4 = vpack.c.bf16 %v25_v3, %v25_v3 }
   0x4   :  { %11 = vsyncpa [#allocation3], 0  ;;  %vm43_vm1 = vcmask 261120   ;;  %v739_v5 = vld [vmem:[%s956_s5] sm:$0xff]   ;;  %s794_s0 = smov 80   ;;  %s795_s28 = smov 112  }
   0x5   :  { %679 = vmatprep.subr.bf16.mxu1 %v739_v5  ;;  %s796_s29 = smov 96   ;;  %v87_v10 = vld [vmem:[%s954_s3] sm:$0xff]  ;;  %s797_s7 = smov 64   ;;  %vm109_vm2 = vcmask 130048   ;;  %vm309_vm4 = vcmask 64512   ;;  %vm345_vm5 = vcmask 1043456  }
   0x6   :  { %674 = vmatpush3.bf16.msra.mxu0 %v738_v2  ;;  %680 = vmatpush3.bf16.msra.mxu1 %v739_v5  ;;  %v88_v17 = vld [vmem:[%s955_s4] sm:$0xff]  ;;  %s798_s4 = smov 16   ;;  %s799_s9 = smov 32   ;;  %vm540_vm6 = vcmask 392192   ;;  %vm575_vm7 = vcmask 523264  }
   0x7   :  { %703 = vmatprep.subr.bf16.mxu0 %v792_v1  ;;  %685 = vmatprep.subr.bf16.mxu1 %v792_v1  ;;  %s800_s18 = smov 48  }
   0x9   :  { %676 = vmatmul.mubr.msk.bf16.vlgmr.msra.gmra.mrb[0].mxu0 %vm43_vm1, %v26_v4  ;;  %v245_v4 = vlaneseq }
   0xa   :  { %705 = vmatprep.mubr.msk.bf16.mxu0 %vm793_vm0, %v792_v1 }
  0xdc   :  { %v858_v6 = vpop.f32.mrb[0].mxu0 }
  0xdd   :  { %98 = vrot.lane.b32.xlu1 %v858_v6, %s794_s0  ;;  %92 = vrot.lane.b32.xlu0 %v858_v6, %s795_s28  ;;  %v677_v7 = vpop.f32.mrb[1].mxu0  ;;  %v212_v22 = vmul.f32 %v87_v10, %v858_v6 }
  0xde   :  { %v84_v8 = vpop.f32.mrb[2].mxu0  ;;  %v248_v7 = vand.u32 127, %v245_v4 }
  0xdf   :  { %v678_v9 = vpop.f32.mrb[3].mxu0 }
  0xe1   :  { %95 = vrot.lane.b32.xlu0 %v858_v6, %s796_s29 }
  0xe5   :  { %225 = vrot.lane.b32.xlu0 %v87_v10, %s797_s7 }
 0x14f   :  { %v93_v11 = vpop.permute.xlu0 %92  ;;  %v99_v13 = vpop.permute.xlu1 %98 }
 0x150   :  { %v101_v12 = vpack.c.bf16 %v93_v11, %v858_v6  ;;  %v215_v25 = vmul.f32 %v99_v13, %v87_v10  ;;  %v213_v29 = vmul.f32 %v93_v11, %v87_v10 }
 0x152   :  { %166 = vrot.lane.b32.xlu1 %v101_v12, %s797_s7  ;;  %681 = vmatprep.mubr.msk.bf16.mxu1 %vm109_vm2, %v101_v12 }
 0x153   :  { %v96_v14 = vpop.permute.xlu0 %95 }
 0x154   :  { %v102_v15 = vpack.c.bf16 %v99_v13, %v96_v14  ;;  %v214_v19 = vmul.f32 %v96_v14, %v87_v10 }
 0x156   :  { %682 = vmatmul.mubr.msk.bf16.vlgmr.msra.gmra.mrb[0].mxu1 %vm109_vm2, %v102_v15 }
 0x157   :  { %686 = vmatpush3.bf16.msra.mxu1 %v739_v5  ;;  %687 = vmatprep.mubr.msk.bf16.mxu1 %vm793_vm0, %v792_v1  ;;  %v226_v42 = vpop.permute.xlu0 %225  ;;  %v246_v5 = vshrl.u32 %v245_v4, 7 }
 0x158   :  { %691 = vmatprep.subr.bf16.mxu1 %v792_v1  ;;  %v228_v44 = vmul.f32 %v226_v42, %v858_v6  ;;  %v229_v45 = vmul.f32 %v226_v42, %v93_v11 }
 0x159   :  { %vm249_vm3 = vcmp.le.s32.totalorder %v248_v7, %v246_v5 }
 0x1c4   :  { %v167_v16 = vpop.permute.xlu1 %166 }
 0x1c5   :  { %688 = vmatmul.mubr.msk.bf16.vlgmr.msra.gmra.mrb[4].mxu1 %vm109_vm2, %v167_v16 }
 0x1c6   :  { %693 = vmatprep.mubr.msk.bf16.mxu1 %vm793_vm0, %v792_v1 }
 0x229   :  { %v683_v18 = vpop.f32.mrb[0].mxu1 }
 0x22a   :  { %v218_v20 = vmul.f32 %v683_v18, %v88_v17  ;;  %v150_v21 = vpop.f32.mrb[1].mxu1 }
 0x22b   :  { %v216_v23 = vmul.f32 %v150_v21, %v88_v17  ;;  %v684_v24 = vpop.f32.mrb[2].mxu1 }
 0x22c   :  { %v222_v26 = vadd.f32 %v218_v20, %v214_v19  ;;  %v219_v27 = vmul.f32 %v684_v24, %v88_v17  ;;  %v153_v28 = vpop.f32.mrb[3].mxu1 }
 0x22d   :  { %v220_v30 = vadd.f32 %v216_v23, %v212_v22  ;;  %v217_v31 = vmul.f32 %v153_v28, %v88_v17 }
 0x22e   :  { %v223_v32 = vadd.f32 %v219_v27, %v215_v25 }
 0x22f   :  { %v221_v33 = vadd.f32 %v217_v31, %v213_v29 }
 0x230   :  { %v243_v34 = vpack.c.bf16 %v223_v32, %v222_v26 }
 0x231   :  { %v242_v35 = vpack.c.bf16 %v221_v33, %v220_v30 }
 0x298   :  { %v205_v36 = vpop.f32.mrb[4].mxu1 }
 0x299   :  { %v230_v37 = vmul.f32 %v205_v36, %v88_v17  ;;  %v689_v38 = vpop.f32.mrb[5].mxu1 }
 0x29a   :  { %v208_v39 = vpop.f32.mrb[6].mxu1 }
 0x29b   :  { %v231_v40 = vmul.f32 %v208_v39, %v88_v17  ;;  %234 = vrot.lane.b32.xlu1 %v230_v37, %s797_s7  ;;  %v690_v41 = vpop.f32.mrb[7].mxu1 }
 0x29d   :  { %236 = vrot.lane.b32.xlu0 %v231_v40, %s797_s7 }
 0x30d   :  { %v235_v43 = vpop.permute.xlu1 %234 }
 0x30e   :  { %v240_v47 = vadd.f32 %v235_v43, %v228_v44  ;;  %v250_v44 = vpack.c.bf16 %v858_v6, %v858_v6 }
 0x30f   :  { %v237_v46 = vpop.permute.xlu0 %236 }
 0x310   :  { %v241_v48 = vadd.f32 %v237_v46, %v229_v45 }
 0x312   :  { %v244_v49 = vpack.c.bf16 %v241_v48, %v240_v47 }
 0x314   :  { %252 = vrot.lane.b32.xlu1 %v244_v49, %s797_s7  ;;  %v390_v50 = vrot.slane %v244_v49, 4 }
 0x316   :  { %391 = vrot.lane.b32.xlu0 %v390_v50, %s797_s7 }
 0x386   :  { %v253_v51 = vpop.permute.xlu1 %252 }
 0x387   :  { %v258_v52 = vsel %vm109_vm2, %v253_v51, 0 }
 0x388   :  { %692 = vmatpush3.bf16.xpose.msra.mxu1 %v258_v52  ;;  %v392_v53 = vpop.permute.xlu0 %391 }
 0x389   :  { %v397_v54 = vsel %vm109_vm2, %v392_v53, 0  ;;  %697 = vmatprep.subr.bf16.mxu1 %v792_v1 }
 0x38a   :  { %704 = vmatpush3.bf16.xpose.msra.mxu0 %v397_v54 }
 0x38b   :  { %715 = vmatprep.subr.bf16.mxu0 %v792_v1 }
 0x38f   :  { %694 = vmatmul.mubr.msk.bf16.vlgmr.msra.gmra.mrb[8].mxu1 %vm109_vm2, %v242_v35 }
 0x390   :  { %699 = vmatprep.mubr.msk.bf16.mxu1 %vm793_vm0, %v792_v1 }
 0x391   :  { %706 = vmatmul.mubr.msk.bf16.vlgmr.msra.gmra.mrb[4].mxu0 %vm109_vm2, %v243_v34 }
 0x392   :  { %723 = vmatprep.mubr.msk.bf16.mxu0 %vm793_vm0, %v792_v1 }
 0x462   :  { %v294_v55 = vpop.f32.mrb[8].mxu1 }
 0x463   :  { %v301_v56 = vmul.f32 0.008333334, %v294_v55  ;;  %v695_v57 = vpop.f32.mrb[9].mxu1 }
 0x464   :  { %v297_v58 = vpop.f32.mrb[10].mxu1  ;;  %v433_v59 = vpop.f32.mrb[4].mxu0 }
 0x465   :  { %744 = vtanh.f32 %v301_v56  ;;  %v302_v60 = vmul.f32 0.008333334, %v297_v58  ;;  %v440_v61 = vmul.f32 0.008333334, %v433_v59  ;;  %v696_v62 = vpop.f32.mrb[11].mxu1  ;;  %v707_v63 = vpop.f32.mrb[5].mxu0 }
 0x466   :  { %v436_v0 = vpop.f32.mrb[6].mxu0 }
 0x467   :  { %746 = vtanh.f32 %v302_v60  ;;  %v441_v2 = vmul.f32 0.008333334, %v436_v0  ;;  %v708_v3 = vpop.f32.mrb[7].mxu0 }
 0x468   :  { %748 = vtanh.f32 %v440_v61 }
 0x469   :  { %750 = vtanh.f32 %v441_v2 }
 0x46f   :  { %v745_v8 = vpop.eup %744 }
 0x470   :  { %v305_v9 = vmul.f32 30.0, %v745_v8 }
 0x471   :  { %v747_v10 = vpop.eup %746 }
 0x472   :  { %v749_v11 = vpop.eup %748  ;;  %v307_v12 = vsel %vm249_vm3, %v305_v9, -inf  ;;  %v306_v13 = vmul.f32 30.0, %v747_v10 }
 0x473   :  { %v751_v14 = vpop.eup %750  ;;  %v310_v15 = vsel %vm309_vm4, %v307_v12, -inf  ;;  %v444_v16 = vmul.f32 30.0, %v749_v11 }
 0x474   :  { %311 = vmax.xlane.f32.xlu1 %v310_v15  ;;  %v308_v17 = vsel %vm249_vm3, %v306_v13, -inf  ;;  %v445_v18 = vmul.f32 30.0, %v751_v14  ;;  %v741_v13 = vld [vmem:[%s953_s2 + $0x8] sm:$0xff]   ;;  %v742_v14 = vld [vmem:[%s953_s2 + $0x10] sm:$0xff]   ;;  %v743_v15 = vld [vmem:[%s953_s2 + $0x18] sm:$0xff]  }
 0x475   :  { %v313_v19 = vsel %vm309_vm4, %v308_v17, -inf  ;;  %v446_v21 = vsel %vm249_vm3, %v444_v16, -inf }
 0x476   :  { %314 = vmax.xlane.f32.xlu0 %v313_v19  ;;  %v447_v20 = vsel %vm249_vm3, %v445_v18, -inf  ;;  %v448_v23 = vsel %vm309_vm4, %v446_v21, -inf }
 0x477   :  { %v451_v22 = vsel %vm309_vm4, %v447_v20, -inf }
 0x478   :  { %452 = vmax.xlane.f32.xlu1 %v451_v22 }
 0x47a   :  { %449 = vmax.xlane.f32.xlu0 %v448_v23 }
 0x501   :  { %v312_v24 = vpop.xlane.xlu1 %311 }
 0x502   :  { %v316_v25 = vsub.f32 %v307_v12, %v312_v24  ;;  %v740_v12 = vld [vmem:[%s953_s2] sm:$0xff]   ;;  %s801_s2 = smov [#allocation2]  }
 0x503   :  { %v315_v26 = vpop.xlane.xlu0 %314  ;;  %716 = vmatpush3.bf16.msra.mxu0 %v740_v12  ;;  %s626_s19 = sshll.u32 %s801_s2, 4  ;;  %s627_s19 = int_to_ptr.vmem [resolvable:$true] %s626_s19 }
 0x504   :  { %v318_v27 = vmul.f32 1.442695, %v316_v25  ;;  %v317_v28 = vsub.f32 %v308_v17, %v315_v26  ;;  %717 = vmatprep.subr.bf16.mxu0 %v792_v1  ;;  %s768_s20 = scalar_lea.vmem %s627_s19, 128  ;;  %p773_p1 = scmp.lt.s32.totalorder %s627_s19, %s627_s19 }
 0x505   :  { %v453_v29 = vpop.xlane.xlu1 %452  ;;  %p769_p0 = scmp.ne.s32.totalorder %s627_s19, %s768_s20  ;;  %p774_p2 = scmp.lt.s32.totalorder %s768_s20, %s768_s20 }
 0x506   :  { %752 = vpow2.f32 %v318_v27  ;;  %v320_v30 = vmul.f32 1.442695, %v317_v28  ;;  %v455_v31 = vsub.f32 %v447_v20, %v453_v29 }
 0x507   :  { %v450_v32 = vpop.xlane.xlu0 %449  ;;  %718 = vmatpush3.bf16.msra.mxu0 %v741_v13  ;;  %p775_p3 = por %p774_p2, %p773_p1 }
 0x508   :  { %754 = vpow2.f32 %v320_v30  ;;  %v458_v33 = vmul.f32 1.442695, %v455_v31  ;;  %v454_v34 = vsub.f32 %v446_v21, %v450_v32  ;;  %719 = vmatprep.subr.bf16.mxu0 %v792_v1 }
 0x509   :  { %p776_p4 = pnand %p775_p3, %p769_p0 }
 0x50a   :  { %756 = vpow2.f32 %v458_v33  ;;  %v456_v35 = vmul.f32 1.442695, %v454_v34 }
 0x50b   :  { %720 = vmatpush3.bf16.msra.mxu0 %v742_v14 }
 0x50c   :  { %758 = vpow2.f32 %v456_v35  ;;  %721 = vmatprep.subr.bf16.mxu0 %v792_v1 }
 0x50f   :  { %722 = vmatpush3.bf16.msra.mxu0 %v743_v15 }
 0x510   :  { %v753_v36 = vpop.eup %752 }
 0x511   :  { %v322_v37 = vsel %vm309_vm4, %v753_v36, 0.0 }
 0x512   :  { %v755_v38 = vpop.eup %754  ;;  %323 = vadd.xlane.f32.xlu0 %v322_v37 }
 0x513   :  { %v325_v39 = vsel %vm309_vm4, %v755_v38, 0.0 }
 0x514   :  { %v757_v40 = vpop.eup %756  ;;  %326 = vadd.xlane.f32.xlu1 %v325_v39 }
 0x515   :  { %v463_v43 = vsel %vm309_vm4, %v757_v40, 0.0 }
 0x516   :  { %v759_v41 = vpop.eup %758 }
 0x517   :  { %v460_v42 = vsel %vm309_vm4, %v759_v41, 0.0 }
 0x518   :  { %461 = vadd.xlane.f32.xlu0 %v460_v42  ;;  %464 = vadd.xlane.f32.xlu1 %v463_v43 }
 0x529   :  { %477 = vrot.lane.b32.xlu1 %v250_v44, %s798_s4 }
 0x52e   :  { %340 = vrot.lane.b32.xlu0 %v250_v44, %s799_s9 }
 0x59f   :  { %v324_v45 = vpop.xlane.xlu0 %323 }
 0x5a0   :  { %760 = vrcp.f32 %v324_v45 }
 0x5a1   :  { %v327_v46 = vpop.xlane.xlu1 %326 }
 0x5a2   :  { %762 = vrcp.f32 %v327_v46 }
 0x5a5   :  { %v462_v47 = vpop.xlane.xlu0 %461  ;;  %v465_v48 = vpop.xlane.xlu1 %464 }
 0x5a6   :  { %764 = vrcp.f32 %v462_v47 }
 0x5a7   :  { %766 = vrcp.f32 %v465_v48 }
 0x5a9   :  { %v341_v49 = vpop.permute.xlu0 %340  ;;  %v478_v3 = vpop.permute.xlu1 %477 }
 0x5aa   :  { %v761_v50 = vpop.eup %760  ;;  %v347_v51 = vsel %vm345_vm5, %v341_v49, 0  ;;  %v483_v8 = vsel %vm345_vm5, %v478_v3, 0 }
 0x5ab   :  { %v330_v6 = vmul.f32 %v761_v50, %v324_v45  ;;  %698 = vmatpush3.bf16.msra.mxu1 %v347_v51 }
 0x5ac   :  { %v763_v52 = vpop.eup %762  ;;  %709 = vmatprep.subr.bf16.mxu1 %v792_v1 }
 0x5ad   :  { %v332_v53 = vsub.f32 2.0, %v330_v6  ;;  %v331_v54 = vmul.f32 %v763_v52, %v327_v46 }
 0x5af   :  { %v334_v55 = vmul.f32 %v761_v50, %v332_v53  ;;  %v333_v56 = vsub.f32 2.0, %v331_v54 }
 0x5b0   :  { %v765_v57 = vpop.eup %764 }
 0x5b1   :  { %v767_v58 = vpop.eup %766  ;;  %v335_v59 = vmul.f32 %v763_v52, %v333_v56  ;;  %v468_v60 = vmul.f32 %v765_v57, %v462_v47  ;;  %v336_v62 = vmul.f32 %v753_v36, %v334_v55 }
 0x5b2   :  { %v469_v61 = vmul.f32 %v767_v58, %v465_v48 }
 0x5b3   :  { %v337_v63 = vmul.f32 %v755_v38, %v335_v59  ;;  %v470_v0 = vsub.f32 2.0, %v468_v60 }
 0x5b4   :  { %v471_v2 = vsub.f32 2.0, %v469_v61 }
 0x5b5   :  { %v338_v4 = vpack.c.bf16 %v337_v63, %v336_v62  ;;  %v472_v5 = vmul.f32 %v765_v57, %v470_v0 }
 0x5b6   :  { %v473_v7 = vmul.f32 %v767_v58, %v471_v2 }
 0x5b7   :  { %700 = vmatmul.mubr.msk.bf16.vlgmr.msra.gmra.mrb[12].mxu1 %vm309_vm4, %v338_v4  ;;  %v474_v9 = vmul.f32 %v759_v41, %v472_v5 }
 0x5b8   :  { %710 = vmatpush3.bf16.msra.mxu1 %v483_v8  ;;  %711 = vmatprep.mubr.msk.bf16.mxu1 %vm793_vm0, %v792_v1  ;;  %v475_v10 = vmul.f32 %v757_v40, %v473_v7 }
 0x5ba   :  { %v476_v11 = vpack.c.bf16 %v475_v10, %v474_v9 }
 0x5bf   :  { %712 = vmatmul.mubr.msk.bf16.vlgmr.msra.gmra.mrb[16].mxu1 %vm309_vm4, %v476_v11 }
 0x68a   :  { %v383_v16 = vpop.f32.mrb[12].mxu1 }
 0x68b   :  { %v701_v17 = vpop.f32.mrb[13].mxu1 }
 0x68c   :  { %v386_v18 = vpop.f32.mrb[14].mxu1 }
 0x68d   :  { %527 = vrot.lane.b32.xlu1 %v386_v18, %s798_s4  ;;  %v702_v19 = vpop.f32.mrb[15].mxu1 }
 0x692   :  { %v519_v20 = vpop.f32.mrb[16].mxu1 }
 0x693   :  { %531 = vrot.lane.b32.xlu0 %v519_v20, %s799_s9  ;;  %v713_v21 = vpop.f32.mrb[17].mxu1 }
 0x694   :  { %v522_v22 = vpop.f32.mrb[18].mxu1 }
 0x695   :  { %535 = vrot.lane.b32.xlu1 %v522_v22, %s800_s18  ;;  %v714_v23 = vpop.f32.mrb[19].mxu1 }
 0x6ff   :  { %v528_v1 = vpop.permute.xlu1 %527 }
 0x700   :  { %v538_v24 = vsel %vm109_vm2, %v383_v16, %v528_v1 }
 0x705   :  { %v532_v25 = vpop.permute.xlu0 %531 }
 0x706   :  { %v539_v26 = vsel %vm43_vm1, %v538_v24, %v532_v25 }
 0x707   :  { %v536_v27 = vpop.permute.xlu1 %535 }
 0x708   :  { %v541_v28 = vsel %vm540_vm6, %v539_v26, %v536_v27 }
 0x709   :  { %v542_v29 = vpack.c.bf16 %v541_v28, %v541_v28 }
 0x70b   :  { %724 = vmatmul.mubr.msk.bf16.vlgmr.msra.gmra.mrb[8].mxu0 %vm575_vm7, %v542_v29 }
 0x7de   :  { %v613_v30 = vpop.f32.mrb[8].mxu0 }
 0x7df   :  { %619 = vst.msk [vmem:[#allocation2] sm:$0xff] %vm43_vm1, %v613_v30  ;;  %v725_v31 = vpop.f32.mrb[9].mxu0 }
 0x7e0   :  { %v616_v32 = vpop.f32.mrb[10].mxu0 }
 0x7e1   :  { %779 = shalt.err (!%p776_p4)
}
 0x7e2   :  { %s780_s23 = scalar_lea.hbm %s957_s6, 128 }
 0x7e3   :  { %p781_p5 = scmp.ne.s32.totalorder %s957_s6, %s780_s23  ;;  %p784_p6 = scmp.lt.u32.totalorder %s780_s23, %s957_s6 }
 0x7e5   :  { %p786_p7 = pnand %p784_p6, %p781_p5 }
 0x7e7   :  { %789 = shalt.err (!%p786_p7)
}
 0x7e8   :  { %629 = dma.vmem_to_hbm [thread:$0]  %s627_s19, 128, %s957_s6, [#allocation3]   ;;  %v726_v33 = vpop.f32.mrb[11].mxu0 }
 0x7e9   :  { %790 = dma.done.wait [#allocation3], 128  }
 0x7ea   :  { %791 = vsyncadd [#allocation3], 4294967168 }
 0x7eb   :  { %633 = vsyncpa [#allocation3], 1 }

</bundles_post_ra>
